<compile_context>
chip_gen: v6e
topology: v6e:2x2x1
jax: 0.10.0
libtpu: 0.0.40
codegen_flags: <defaults>
</compile_context>

<pallas_src>
import jax
import jax.numpy as jnp
from jax.experimental import pallas as pl
from jax.experimental.pallas import tpu as pltpu


def _latenmin_relu_kernel(xmin_ref, x_ref, o_ref):
    # xmin_ref: (1, W), x_ref/o_ref: (TR, W).  Broadcast over rows, relu = max(.,0).
    o_ref[...] = jnp.maximum(xmin_ref[...] - x_ref[...], 0.0)


def _run_tiled(x2, xmin2, block_rows):
    """x2: (R, W), xmin2: (1, W) -> relu(xmin2 - x2), row-tiled pallas_call."""
    R, W = x2.shape
    tr = min(block_rows, R)
    if tr != R:
        # sublane-aligned tile height (multiple of 8) when not taking the full extent
        tr = max(8, (tr // 8) * 8)
    grid = (pl.cdiv(R, tr),)
    return pl.pallas_call(
        _latenmin_relu_kernel,
        out_shape=jax.ShapeDtypeStruct((R, W), x2.dtype),
        grid=grid,
        in_specs=[
            pl.BlockSpec((1, W), lambda i: (0, 0)),    # xmin resident across all tiles
            pl.BlockSpec((tr, W), lambda i: (i, 0)),
        ],
        out_specs=pl.BlockSpec((tr, W), lambda i: (i, 0)),
        compiler_params=pltpu.CompilerParams(
            dimension_semantics=("parallel",)),        # lets v7x split rows across its 2 TCs
    )(xmin2, x2)


def latenmin_relu(x, xmin, *, block_rows=512):
    """x: (N, L) f32, xmin: scalar / (L,) / (1, L) f32  ->  relu(xmin - x), shape (N, L)."""
    N, L = x.shape
    xmin_row = jnp.broadcast_to(jnp.asarray(xmin, dtype=x.dtype).reshape(-1), (L,))

    LANE = 128
    if (LANE % L == 0) and ((N * L) % LANE == 0):
        # Lane-dense slab path: pack 128//L consecutive L-wide rows into one 128-lane row.
        reps = LANE // L
        rows = (N * L) // LANE
        x_slab = x.reshape(rows, LANE)
        xmin_slab = jnp.tile(xmin_row, reps).reshape(1, LANE)
        out_slab = _run_tiled(x_slab, xmin_slab, block_rows)
        return out_slab.reshape(N, L)

    # General path: L is the full (untiled) last dim of the block.
    return _run_tiled(x, xmin_row.reshape(1, L), block_rows)


def reference(x, xmin):
    xmin_row = jnp.broadcast_to(jnp.asarray(xmin, dtype=x.dtype).reshape(-1), (1, x.shape[1]))
    return jnp.maximum(xmin_row - x, 0.0)


if __name__ == "__main__":
    key = jax.random.PRNGKey(0)
    kx, km, kx2, km2 = jax.random.split(key, 4)

    # Primary test: latent batch, hidden=32  ->  hits the lane-dense slab path.
    batch, nlatent = 64, 32
    x = jax.random.normal(kx, (batch, nlatent), dtype=jnp.float32)
    xmin = jax.random.uniform(km, (nlatent,), dtype=jnp.float32, minval=-1.0, maxval=1.0)

    out = latenmin_relu(x, xmin)
    out = jax.block_until_ready(out)
    ref = reference(x, xmin)
    assert out.shape == (batch, nlatent)
    assert jnp.allclose(out, ref, atol=1e-6, rtol=1e-6), "mismatch vs reference (lane-dense path)"

    # Secondary test: width not a divisor of 128  ->  exercises the general path.
    x_g = jax.random.normal(kx2, (8, 48), dtype=jnp.float32)
    xmin_g = jax.random.uniform(km2, (48,), dtype=jnp.float32, minval=-1.0, maxval=1.0)
    out_g = jax.block_until_ready(latenmin_relu(x_g, xmin_g))
    assert jnp.allclose(out_g, reference(x_g, xmin_g), atol=1e-6, rtol=1e-6), \
        "mismatch vs reference (general path)"

    print("KERNEL_OK")
</pallas_src>

<mosaic_0001>
module attributes {stable_mosaic.version = 11 : i64} {
  func.func @_latenmin_relu_kernel(%arg0: i32, %arg1: memref<1x128xf32, #tpu.memory_space<vmem>>, %arg2: memref<16x128xf32, #tpu.memory_space<vmem>>, %arg3: memref<16x128xf32, #tpu.memory_space<vmem>>) attributes {dimension_semantics = [#tpu.dimension_semantics<parallel>], iteration_bounds = array<i64: 1>, scalar_prefetch = 0 : i64, scratch_operands = 0 : i64, tpu.core_type = #tpu.core_type<tc>, window_params = [{pipeline_mode = #tpu.pipeline_mode<synchronous>, transform_indices = @transform_0, window_bounds = array<i64: 1, 128>}, {transform_indices = @transform_1, window_bounds = array<i64: 16, 128>}, {transform_indices = @transform_2, window_bounds = array<i64: 16, 128>}]} {
    %c0 = arith.constant 0 : index
    %c0_0 = arith.constant 0 : index
    %0 = vector.load %arg1[%c0, %c0_0] : memref<1x128xf32, #tpu.memory_space<vmem>>, vector<1x128xf32>
    %c0_1 = arith.constant 0 : index
    %c0_2 = arith.constant 0 : index
    %1 = vector.load %arg2[%c0_1, %c0_2] : memref<16x128xf32, #tpu.memory_space<vmem>>, vector<16x128xf32>
    %2 = vector.broadcast %0 : vector<1x128xf32> to vector<16x128xf32>
    %3 = arith.subf %2, %1 : vector<16x128xf32>
    %cst = arith.constant 0.000000e+00 : f32
    %4 = vector.broadcast %cst : f32 to vector<16x128xf32>
    %5 = arith.maximumf %3, %4 : vector<16x128xf32>
    %c0_3 = arith.constant 0 : index
    %c0_4 = arith.constant 0 : index
    %6 = vector.load %arg3[%c0_3, %c0_4] : memref<16x128xf32, #tpu.memory_space<vmem>>, vector<16x128xf32>
    tpu.vector_store %arg3[%c0_3, %c0_4], %5 {strides = array<i32>} : memref<16x128xf32, #tpu.memory_space<vmem>>, vector<16x128xf32>,
    return
  }
  func.func @transform_0(%arg0: i32) -> (i32, i32) {
    %c0_i32 = arith.constant 0 : i32
    %c0_i32_0 = arith.constant 0 : i32
    %c0_i32_1 = arith.constant 0 : i32
    return %c0_i32, %c0_i32_0 : i32, i32
  }
  func.func @transform_1(%arg0: i32) -> (i32, i32) {
    %c0_i32 = arith.constant 0 : i32
    %c0_i32_0 = arith.constant 0 : i32
    return %arg0, %c0_i32 : i32, i32
  }
  func.func @transform_2(%arg0: i32) -> (i32, i32) {
    %c0_i32 = arith.constant 0 : i32
    %c0_i32_0 = arith.constant 0 : i32
    return %arg0, %c0_i32 : i32, i32
  }
}

</mosaic_0001>

<bundles_post_ra>
// kernel: tpu_custom_call.1
= control target key start
LH: loop header
LB: loop body
LE: loop exit
PB: predicated region body
PF: predicated region fallthrough
CT: control target
= control target key end

     0   :  { %7 = vsyncpa [#allocation3], 0  ;;  %s172_s0 = inlined_call_operand.hbm [shape: f32[1,128], index: 0, kind: input, shape index: {}]   ;;  %s173_s1 = inlined_call_operand.hbm [shape: f32[16,128], index: 1, kind: input, shape index: {}]   ;;  %s174_s2 = inlined_call_operand.hbm [shape: f32[16,128], index: 2, kind: output, shape index: {}]  }
   0x1   :  { %8 = vsyncpa [#allocation6], 0 }
   0x2   :  { %9 = vsyncpa [#allocation4], 0  ;;  %s143_s9 = smov [#allocation2]   ;;  %s144_s11 = smov [#allocation5]  }
   0x3   :  { %s16_s10 = sshll.u32 %s143_s9, 4  ;;  %s25_s12 = sshll.u32 %s144_s11, 4  ;;  %s17_s10 = int_to_ptr.vmem [resolvable:$true] %s16_s10  ;;  %s26_s12 = int_to_ptr.vmem [resolvable:$true] %s25_s12 }
   0x4   :  { %s85_s13 = scalar_lea.vmem %s17_s10, 16  ;;  %s89_s14 = scalar_lea.vmem %s17_s10, 32 }
   0x5   :  { %p86_p0 = scmp.ne.s32.totalorder %s17_s10, %s85_s13  ;;  %p90_p1 = scmp.lt.s32.totalorder %s17_s10, %s17_s10 }
   0x6   :  { %p91_p2 = scmp.lt.s32.totalorder %s89_s14, %s85_s13 }
   0x8   :  { %p92_p3 = por %p91_p2, %p90_p1 }
   0xa   :  { %p93_p4 = pnand %p92_p3, %p86_p0 }
   0xc   :  { %96 = shalt.err (!%p93_p4)
}
   0xd   :  { %19 = dma.hbm_to_vmem [thread:$0]  %s172_s0, 16, %s17_s10, [#allocation3]  }
   0xe   :  { %s105_s17 = scalar_lea.vmem %s26_s12, 256  ;;  %p110_p6 = scmp.lt.s32.totalorder %s26_s12, %s26_s12 }
   0xf   :  { %p106_p5 = scmp.ne.s32.totalorder %s26_s12, %s105_s17  ;;  %p111_p7 = scmp.lt.s32.totalorder %s105_s17, %s105_s17 }
  0x11   :  { %p112_p8 = por %p111_p7, %p110_p6 }
  0x13   :  { %p113_p9 = pnand %p112_p8, %p106_p5 }
  0x15   :  { %116 = shalt.err (!%p113_p9)
}
  0x16   :  { %s145_s18 = smov 128   ;;  %s146_s19 = smov 8  }
  0x17   :  { %31 = dma.hbm_to_vmem [thread:$0]  %s173_s1, 256, %s26_s12, [#allocation6], %s145_s18, %s145_s18, %s146_s19  }
  0x18   :  { %137 = dma.done.wait [#allocation3], 16  }
  0x19   :  { %138 = vsyncadd [#allocation3], 4294967280 }
  0x1a   :  { %139 = dma.done.wait [#allocation6], 256  }
  0x1b   :  { %140 = vsyncadd [#allocation6], 4294967040  ;;  %v71_v0 = vld [vmem:[#allocation2] ss:$0 sm:$0xff]  ;;  %v39_v1 = vld [vmem:[#allocation5] sm:$0xff]  ;;  %s147_s0 = smov [#allocation7]  }
  0x1c   :  { %v40_v2 = vld [vmem:[#allocation5 + $0x8] sm:$0xff]  ;;  %s58_s22 = sshll.u32 %s147_s0, 4  ;;  %v47_v3 = vsub.f32 %v71_v0, %v39_v1  ;;  %s59_s22 = int_to_ptr.vmem [resolvable:$true] %s58_s22 }
  0x1d   :  { %v48_v4 = vsub.f32 %v71_v0, %v40_v2  ;;  %s117_s23 = scalar_lea.vmem %s59_s22, 256  ;;  %p122_p11 = scmp.lt.s32.totalorder %s59_s22, %s59_s22 }
  0x1e   :  { %v49_v5 = vmax.f32 %v47_v3, 0.0  ;;  %p118_p10 = scmp.ne.s32.totalorder %s59_s22, %s117_s23  ;;  %p123_p12 = scmp.lt.s32.totalorder %s117_s23, %s117_s23 }
  0x1f   :  { %v50_v6 = vmax.f32 %v48_v4, 0.0 }
  0x20   :  { %51 = vst [vmem:[#allocation7] sm:$0xff] %v49_v5  ;;  %p124_p13 = por %p123_p12, %p122_p11 }
  0x21   :  { %52 = vst [vmem:[#allocation7 + $0x8] sm:$0xff] %v50_v6 }
  0x22   :  { %p125_p0 = pnand %p124_p13, %p118_p10 }
  0x24   :  { %128 = shalt.err (!%p125_p0)
}
  0x25   :  { %64 = dma.vmem_to_hbm [thread:$0]  %s59_s22, 256, %s174_s2, [#allocation4], %s145_s18, %s145_s18, %s146_s19  }
  0x26   :  { %141 = dma.done.wait [#allocation4], 256  }
  0x27   :  { %142 = vsyncadd [#allocation4], 4294967040 }
  0x28   :  { %68 = vsyncpa [#allocation3], 1 }
  0x29   :  { %69 = vsyncpa [#allocation6], 1 }
  0x2a   :  { %70 = vsyncpa [#allocation4], 1 }

</bundles_post_ra>
